<compile_context>
chip_gen: v7x
topology: tpu7x:2x2x1
jax: 0.10.0
libtpu: 0.0.40
codegen_flags: <defaults>
</compile_context>

<pallas_src>
import jax
import jax.numpy as jnp
from jax.experimental import pallas as pl
from jax.experimental.pallas import tpu as pltpu


def _marker_embed_kernel(idx_ref, fused_t_ref, out_ref):
    # idx_ref     : (1, TN) int32   -- raw marker indices (may contain -1)
    # fused_t_ref : (F, V)  float32 -- (emb_table @ W.T + b) transposed
    # out_ref     : (TN, F)         -- output tile in the module's layout
    shifted = idx_ref[...] + 1                   # the `x + 1` of the forward pass
    f, v = fused_t_ref.shape
    tn = out_ref.shape[0]

    # one-hot^T selector (V, TN): lane-dense over tokens (cheapest VPU layout).
    row = jax.lax.broadcasted_iota(jnp.int32, (v, tn), 0)       # (V, TN)
    onehot_t = (row == shifted).astype(jnp.float32)             # broadcast over lanes

    # Exact row gather as an MXU matmul: (F, V) @ (V, TN) -> (F, TN).
    out_t = jnp.dot(fused_t_ref[...], onehot_t,
                    preferred_element_type=jnp.float32)
    # Transpose in-kernel (XLU, hidden under DMA/store slack) so the HBM
    # writeback is already in (tokens, F) layout -- no XLA transpose outside.
    out_ref[...] = out_t.T.astype(out_ref.dtype)


def precompute_fused_table(emb_table, w_t, bias):
    """Module-init-time fusion: Embedding row @ Linear -> single (F, V) table.

    fused[v] = emb_table[v] @ W.T + b, so onehot-gather of `fused` equals
    Embedding followed by Linear (padding row 0 -> pure bias, matching
    Embedding(pad)=0 then Linear+b).
    """
    fused = (emb_table.astype(jnp.float32) @ w_t.astype(jnp.float32)
             + bias.astype(jnp.float32)[None, :])               # (V, F)
    return fused.T                                              # (F, V)


def _pick_token_tile(n_tokens, target=8192):
    """Token tile: multiple of 128; large enough to amortize the ~0.35us
    per-grid-step overhead; small enough that v7x's two TensorCores both get
    at least one tile when the workload allows."""
    n128 = int(pl.cdiv(max(n_tokens, 1), 128)) * 128
    if n128 <= 256:
        return n128
    half = int(pl.cdiv(n128 // 2, 128)) * 128    # ~2 grid steps
    return min(target, half)


def marker_name_embedding(x, fused_t, *, token_tile=None, out_dtype=jnp.float32):
    """x: (batch, seq) int; fused_t: (F, V) from precompute_fused_table()."""
    batch, seq = x.shape
    n = batch * seq
    f, v = fused_t.shape

    if token_tile is None:
        token_tile = _pick_token_tile(n)
    assert token_tile % 128 == 0, "token_tile must be a multiple of 128 (lane dim)"

    # Lane-dense index layout, padded to a tile multiple with the padding index.
    n_pad = int(pl.cdiv(n, token_tile)) * token_tile
    idx = x.reshape(1, n).astype(jnp.int32)
    if n_pad != n:
        idx = jnp.pad(idx, ((0, 0), (0, n_pad - n)), constant_values=-1)

    out_itemsize = jnp.dtype(out_dtype).itemsize
    cost = pl.CostEstimate(
        flops=2 * n_pad * v * f,
        transcendentals=0,
        bytes_accessed=idx.size * 4 + fused_t.size * 4 + n_pad * f * out_itemsize,
    )

    out_flat = pl.pallas_call(
        _marker_embed_kernel,
        out_shape=jax.ShapeDtypeStruct((n_pad, f), out_dtype),
        grid_spec=pltpu.PrefetchScalarGridSpec(
            num_scalar_prefetch=0,
            grid=(n_pad // token_tile,),
            in_specs=[
                pl.BlockSpec((1, token_tile), lambda i: (0, i)),  # indices (lane-dense)
                pl.BlockSpec((f, v), lambda i: (0, 0)),           # fused table (resident)
            ],
            out_specs=pl.BlockSpec((token_tile, f), lambda i: (i, 0)),
        ),
        compiler_params=pltpu.CompilerParams(
            dimension_semantics=("parallel",),
            vmem_limit_bytes=32 * 1024 * 1024,
        ),
        cost_estimate=cost,
    )(idx, fused_t)

    # Drop token padding (cheap), then a free reshape -- no HBM transpose.
    return out_flat[:n].reshape(batch, seq, f)


def reference(x, emb_table, w_t, bias):
    """Pure-JAX reference mirroring the PyTorch forward."""
    shifted = x + 1
    emb = emb_table[shifted]                 # (batch, seq, E)
    return emb @ w_t + bias                  # (batch, seq, F)


if __name__ == "__main__":
    key = jax.random.PRNGKey(0)
    k_emb, k_w, k_b, k_x = jax.random.split(key, 4)

    num_markers = 10
    emb_dim = 32
    n_filters = 16
    batch, seq = 2, 8

    # Deterministic synthetic "pre-trained" marker embeddings.
    marker_embeddings = jax.random.normal(k_emb, (num_markers, emb_dim), jnp.float32)
    # Prepend the zero padding row (padding_idx=0), as in __init__.
    emb_table = jnp.concatenate(
        [jnp.zeros((1, emb_dim), jnp.float32), marker_embeddings], axis=0
    )  # (V, E) with V = num_markers + 1

    # nn.Linear(emb_dim, n_filters): weight (F, E), bias (F,)
    w = jax.random.normal(k_w, (n_filters, emb_dim), jnp.float32) * 0.05
    b = jax.random.normal(k_b, (n_filters,), jnp.float32) * 0.05
    w_t = w.T  # (E, F)

    # "Module init": fuse the frozen embedding table with the linear layer once.
    fused_t = precompute_fused_table(emb_table, w_t, b)  # (F, V)

    # Indices in [-1, num_markers-1]; -1 maps to the padding (zero) row.
    x = jax.random.randint(k_x, (batch, seq), -1, num_markers, dtype=jnp.int32)

    out = marker_name_embedding(x, fused_t)
    out = jax.block_until_ready(out)

    ref = reference(x, emb_table, w_t, b)
    assert out.shape == (batch, seq, n_filters)
    assert jnp.allclose(out, ref, atol=1e-5, rtol=1e-5), "mismatch vs reference"

    print("KERNEL_OK")
</pallas_src>

<mosaic_0001>
module attributes {stable_mosaic.version = 11 : i64} {
  func.func @_marker_embed_kernel(%arg0: i32, %arg1: memref<1x128xi32, #tpu.memory_space<vmem>>, %arg2: memref<16x11xf32, #tpu.memory_space<vmem>>, %arg3: memref<128x16xf32, #tpu.memory_space<vmem>>) attributes {dimension_semantics = [#tpu.dimension_semantics<parallel>], iteration_bounds = array<i64: 1>, scalar_prefetch = 0 : i64, scratch_operands = 0 : i64, tpu.core_type = #tpu.core_type<tc>, window_params = [{transform_indices = @transform_0, window_bounds = array<i64: 1, 128>}, {pipeline_mode = #tpu.pipeline_mode<synchronous>, transform_indices = @transform_1, window_bounds = array<i64: 16, 11>}, {transform_indices = @transform_2, window_bounds = array<i64: 128, 16>}]} {
    %c0 = arith.constant 0 : index
    %c0_0 = arith.constant 0 : index
    %0 = vector.load %arg1[%c0, %c0_0] : memref<1x128xi32, #tpu.memory_space<vmem>>, vector<1x128xi32>
    %c1_i32 = arith.constant 1 : i32
    %1 = vector.broadcast %c1_i32 : i32 to vector<1x128xi32>
    %2 = arith.addi %0, %1 : vector<1x128xi32>
    %3 = tpu.iota {dimensions = array<i32: 0>} : vector<11x128xi32>
    %4 = vector.broadcast %2 : vector<1x128xi32> to vector<11x128xi32>
    %5 = arith.cmpi eq, %3, %4 : vector<11x128xi32>
    %6 = arith.extui %5 : vector<11x128xi1> to vector<11x128xi32>
    %7 = arith.sitofp %6 : vector<11x128xi32> to vector<11x128xf32>
    %c0_1 = arith.constant 0 : index
    %c0_2 = arith.constant 0 : index
    %8 = vector.load %arg2[%c0_1, %c0_2] : memref<16x11xf32, #tpu.memory_space<vmem>>, vector<16x11xf32>
    %cst = arith.constant dense<0.000000e+00> : vector<16x128xf32>
    %9 = tpu.matmul %8, %7, %cst {dimension_numbers = #tpu.dot_dimension_numbers<[1], [0], [0], [1], [0, 0, 1, 1], [], []>} : vector<16x11xf32>, vector<11x128xf32>, vector<16x128xf32> -> vector<16x128xf32>
    %10 = tpu.transpose %9, [1, 0] : vector<16x128xf32> -> vector<128x16xf32>
    %c0_3 = arith.constant 0 : index
    %c0_4 = arith.constant 0 : index
    %11 = vector.load %arg3[%c0_3, %c0_4] : memref<128x16xf32, #tpu.memory_space<vmem>>, vector<128x16xf32>
    tpu.vector_store %arg3[%c0_3, %c0_4], %10 {strides = array<i32>} : memref<128x16xf32, #tpu.memory_space<vmem>>, vector<128x16xf32>,
    return
  }
  func.func @transform_0(%arg0: i32) -> (i32, i32) {
    %c0_i32 = arith.constant 0 : i32
    %c0_i32_0 = arith.constant 0 : i32
    return %c0_i32, %arg0 : i32, i32
  }
  func.func @transform_1(%arg0: i32) -> (i32, i32) {
    %c0_i32 = arith.constant 0 : i32
    %c0_i32_0 = arith.constant 0 : i32
    %c0_i32_1 = arith.constant 0 : i32
    return %c0_i32, %c0_i32_0 : i32, i32
  }
  func.func @transform_2(%arg0: i32) -> (i32, i32) {
    %c0_i32 = arith.constant 0 : i32
    %c0_i32_0 = arith.constant 0 : i32
    return %arg0, %c0_i32 : i32, i32
  }
}

</mosaic_0001>

<bundles_post_ra>
// kernel: tpu_custom_call.1
= control target key start
LH: loop header
LB: loop body
LE: loop exit
PB: predicated region body
PF: predicated region fallthrough
CT: control target
= control target key end

     0   :  { %7 = vsyncpa [#allocation3], 0  ;;  %s390_s0 = inlined_call_operand.hbm [shape: s32[1,128], index: 0, kind: input, shape index: {}]   ;;  %s391_s1 = inlined_call_operand.hbm [shape: f32[16,11], index: 1, kind: input, shape index: {}]   ;;  %s392_s2 = inlined_call_operand.vmem [shape: f32[128,16], index: 2, kind: output, shape index: {}]  }
   0x1   :  { %8 = vsyncpa [#allocation5], 0  ;;  %s272_s9 = smov [#allocation2]   ;;  %s273_s11 = smov [#allocation4]  }
   0x2   :  { %s15_s10 = sshll.u32 %s272_s9, 4  ;;  %s24_s12 = sshll.u32 %s273_s11, 4  ;;  %s16_s10 = int_to_ptr.vmem [resolvable:$true] %s15_s10  ;;  %s293_s12 = int_to_ptr.vmem [resolvable:$true] %s24_s12 }
   0x3   :  { %s224_s15 = scalar_lea.hbm %s390_s0, 16 }
   0x4   :  { %p225_p0 = scmp.ne.s32.totalorder %s390_s0, %s224_s15  ;;  %p228_p1 = scmp.lt.u32.totalorder %s224_s15, %s390_s0 }
   0x6   :  { %p230_p2 = pnand %p228_p1, %p225_p0 }
   0x8   :  { %233 = shalt.err (!%p230_p2)
}
   0x9   :  { %s234_s20 = scalar_lea.vmem %s16_s10, 16  ;;  %s238_s21 = scalar_lea.vmem %s16_s10, 32 }
   0xa   :  { %p235_p3 = scmp.ne.s32.totalorder %s16_s10, %s234_s20  ;;  %p239_p4 = scmp.lt.s32.totalorder %s16_s10, %s16_s10 }
   0xb   :  { %p240_p5 = scmp.lt.s32.totalorder %s238_s21, %s234_s20 }
   0xd   :  { %p241_p6 = por %p240_p5, %p239_p4 }
   0xf   :  { %p242_p7 = pnand %p241_p6, %p235_p3 }
  0x11   :  { %245 = shalt.err (!%p242_p7)
}
  0x12   :  { %18 = dma.hbm_to_vmem [thread:$0]  %s390_s0, 16, %s16_s10, [#allocation3]  }
  0x13   :  { %s246_s26 = scalar_lea.hbm %s391_s1, 256 }
  0x14   :  { %p247_p8 = scmp.ne.s32.totalorder %s391_s1, %s246_s26  ;;  %p250_p9 = scmp.lt.u32.totalorder %s246_s26, %s391_s1 }
  0x16   :  { %p252_p10 = pnand %p250_p9, %p247_p8 }
  0x18   :  { %255 = shalt.err (!%p252_p10)
}
  0x19   :  { %s256_s3 = scalar_lea.vmem %s293_s12, 256  ;;  %p261_p12 = scmp.lt.s32.totalorder %s293_s12, %s293_s12 }
  0x1a   :  { %p257_p11 = scmp.ne.s32.totalorder %s293_s12, %s256_s3  ;;  %p262_p13 = scmp.lt.s32.totalorder %s256_s3, %s256_s3 }
  0x1c   :  { %p263_p0 = por %p262_p13, %p261_p12 }
  0x1e   :  { %p264_p1 = pnand %p263_p0, %p257_p11 }
  0x20   :  { %267 = shalt.err (!%p264_p1)
}
  0x21   :  { %s274_s0 = smov 128   ;;  %s275_s4 = smov 8  }
  0x22   :  { %30 = dma.hbm_to_vmem [thread:$0]  %s391_s1, 256, %s293_s12, [#allocation5], %s274_s0, %s274_s0, %s275_s4  }
  0x23   :  { %268 = dma.done.wait [#allocation3], 16  }
  0x24   :  { %269 = vsyncadd [#allocation3], 4294967280 }
  0x25   :  { %270 = dma.done.wait [#allocation5], 256  }
  0x26   :  { %271 = vsyncadd [#allocation5], 4294967040  ;;  %v39_v0 = vlaneseq  ;;  %vm54_vm0 = vcmask 89088   ;;  %v37_v3 = vld [vmem:[#allocation2] sm:$0x1]  ;;  %v52_v4 = vld [vmem:[#allocation4] sm:$0xff] }
  0x27   :  { %v38_v5 = vadd.s32 1, %v37_v3  ;;  %209 = vmatprep.mubr.msk.f32.mxu0 %vm54_vm0, %v52_v4  ;;  %vm61_vm1 = vcmask 1042432   ;;  %v276_v8 = vmov 0.0   ;;  %v277_v10 = vmov 1.0   ;;  %v53_v12 = vld [vmem:[#allocation4 + $0x8] sm:$0xff] }
  0x28   :  { %v40_v1 = vshrl.u32 %v39_v0, 7  ;;  %vm172_vm5 = vcmask 130048  }
  0x2a   :  { %v44_v2 = vsub.s32 0, %v40_v1  ;;  %v41_v6 = vadd.s32 8, %v40_v1 }
  0x2c   :  { %v45_v7 = vrot.slane %v38_v5, %v44_v2 }
  0x2e   :  { %vm46_vm2 = vcmp.eq.s32.totalorder %v40_v1, %v45_v7  ;;  %vm47_vm3 = vcmp.eq.s32.totalorder %v41_v6, %v45_v7 }
  0x2f   :  { %v196_v9 = vsel %vm47_vm3, 1.0, %v276_v8  ;;  %vm213_vm4 = vmpackc.low %vm61_vm1, %vm46_vm2 }
  0x30   :  { %v212_v11 = vpack.c.bf16 %v196_v9, %v277_v10 }
  0x32   :  { %214 = vmatprep.subr.msk.bf16.mxu0 %vm213_vm4, %v212_v11 }
  0x33   :  { %217 = vmatpush3.bf16.msk.msra.mxu0 %vm213_vm4, %v212_v11 }
  0x36   :  { %210 = vmatmul.mubr.msk.f32.vlgmr.msra.gmra.mrb[0].mxu0 %vm54_vm0, %v53_v12 }
 0x109   :  { %v211_v13 = vpop.f32.mrb[0].mxu0 }
 0x10a   :  { %v131_v14 = vpop.f32.mrb[1].mxu0 }
 0x10b   :  { %140 = vxpose.xlu0.b32.start [1/2] (short) %v131_v14, 128 }
 0x10f   :  { %141 = vxpose.xlu0.b32.end [2/2] (short) %v211_v13, 128 }
 0x18b   :  { %v156_v15 = vpop.trf.xlu0 }
 0x18c   :  { %173 = vst.msk [vmem:[%s392_s2] sm:$0xff] %vm172_vm5, %v156_v15 }
 0x18f   :  { %v157_v16 = vpop.trf.xlu0 }
 0x190   :  { %174 = vst.msk [vmem:[%s392_s2 + $0x8] sm:$0xff] %vm172_vm5, %v157_v16 }
 0x193   :  { %v158_v17 = vpop.trf.xlu0 }
 0x194   :  { %175 = vst.msk [vmem:[%s392_s2 + $0x10] sm:$0xff] %vm172_vm5, %v158_v17 }
 0x197   :  { %v159_v18 = vpop.trf.xlu0 }
 0x198   :  { %176 = vst.msk [vmem:[%s392_s2 + $0x18] sm:$0xff] %vm172_vm5, %v159_v18 }
 0x19b   :  { %v160_v19 = vpop.trf.xlu0 }
 0x19c   :  { %177 = vst.msk [vmem:[%s392_s2 + $0x20] sm:$0xff] %vm172_vm5, %v160_v19 }
 0x19f   :  { %v161_v20 = vpop.trf.xlu0 }
 0x1a0   :  { %178 = vst.msk [vmem:[%s392_s2 + $0x28] sm:$0xff] %vm172_vm5, %v161_v20 }
 0x1a3   :  { %v162_v21 = vpop.trf.xlu0 }
 0x1a4   :  { %179 = vst.msk [vmem:[%s392_s2 + $0x30] sm:$0xff] %vm172_vm5, %v162_v21 }
 0x1a7   :  { %v163_v22 = vpop.trf.xlu0 }
 0x1a8   :  { %180 = vst.msk [vmem:[%s392_s2 + $0x38] sm:$0xff] %vm172_vm5, %v163_v22 }
 0x1ab   :  { %v164_v23 = vpop.trf.xlu0 }
 0x1ac   :  { %181 = vst.msk [vmem:[%s392_s2 + $0x40] sm:$0xff] %vm172_vm5, %v164_v23 }
 0x1af   :  { %v165_v24 = vpop.trf.xlu0 }
 0x1b0   :  { %182 = vst.msk [vmem:[%s392_s2 + $0x48] sm:$0xff] %vm172_vm5, %v165_v24 }
 0x1b3   :  { %v166_v25 = vpop.trf.xlu0 }
 0x1b4   :  { %183 = vst.msk [vmem:[%s392_s2 + $0x50] sm:$0xff] %vm172_vm5, %v166_v25 }
 0x1b7   :  { %v167_v26 = vpop.trf.xlu0 }
 0x1b8   :  { %184 = vst.msk [vmem:[%s392_s2 + $0x58] sm:$0xff] %vm172_vm5, %v167_v26 }
 0x1bb   :  { %v168_v27 = vpop.trf.xlu0 }
 0x1bc   :  { %185 = vst.msk [vmem:[%s392_s2 + $0x60] sm:$0xff] %vm172_vm5, %v168_v27 }
 0x1bf   :  { %v169_v28 = vpop.trf.xlu0 }
 0x1c0   :  { %186 = vst.msk [vmem:[%s392_s2 + $0x68] sm:$0xff] %vm172_vm5, %v169_v28 }
 0x1c3   :  { %v170_v29 = vpop.trf.xlu0 }
 0x1c4   :  { %187 = vst.msk [vmem:[%s392_s2 + $0x70] sm:$0xff] %vm172_vm5, %v170_v29 }
 0x1c7   :  { %v171_v30 = vpop.trf.xlu0 }
 0x1c8   :  { %188 = vst.msk [vmem:[%s392_s2 + $0x78] sm:$0xff] %vm172_vm5, %v171_v30 }
 0x1c9   :  { %193 = vsyncpa [#allocation3], 1 }
 0x1ca   :  { %194 = vsyncpa [#allocation5], 1 }

</bundles_post_ra>
